<compile_context>
chip_gen: v7x
topology: tpu7x:2x2x1
jax: 0.10.0
libtpu: 0.0.40
codegen_flags: <defaults>
</compile_context>

<pallas_src>
import math

import jax
import jax.numpy as jnp
from jax.experimental import pallas as pl
from jax.experimental.pallas import tpu as pltpu

IN_FEATURES = 60
OUT_FEATURES = 40

# Batch-tiling thresholds for the gridded (large-batch) path.
TM_SINGLE = 1024   # up to this batch size, use a single resident block (grid of 1)
TM_MAX = 2048      # max rows per tile when gridding (multiple of 8, VMEM-trivial)


def _fused_linear_kernel(x_ref, w_ref, b_ref, o_ref):
    """o = x @ W_sum + b_sum   (one MXU matmul, f32 accumulate, native widths)."""
    o_ref[...] = (
        jnp.dot(x_ref[...], w_ref[...], preferred_element_type=jnp.float32)
        + b_ref[...]
    ).astype(o_ref.dtype)


def _pick_tile(batch):
    """Choose the batch tile size.

    batch <= TM_SINGLE : one block covering the whole batch (block dim == full
                         array dim, so any batch -- even 1 -- is legal).
    batch  > TM_SINGLE : >= 4 tiles (keeps both v7x TensorCores fed), rows per
                         tile rounded up to a multiple of 8, capped at TM_MAX.
    """
    if batch <= TM_SINGLE:
        return batch
    tm = -(-batch // 4)            # cdiv(batch, 4)
    tm = ((tm + 7) // 8) * 8       # round up to sublane multiple
    return min(tm, TM_MAX)


def fused_linear_sum(x, w_sum, b_sum):
    """x: (B, IN_FEATURES); w_sum: (IN_FEATURES, OUT_FEATURES); b_sum: (1, OUT_FEATURES).

    Returns (B, OUT_FEATURES) = x @ w_sum + b_sum.  No host-side padding or
    slicing; ragged last batch tiles are handled by Pallas partial-block DMA
    (OOB reads unused, OOB writes dropped).
    """
    batch = x.shape[0]
    tm = _pick_tile(batch)
    num_tiles = pl.cdiv(batch, tm)

    return pl.pallas_call(
        _fused_linear_kernel,
        out_shape=jax.ShapeDtypeStruct((batch, OUT_FEATURES), x.dtype),
        grid_spec=pltpu.PrefetchScalarGridSpec(
            num_scalar_prefetch=0,
            grid=(num_tiles,),
            in_specs=[
                # x tiles stream over the batch axis; last dim is full extent (60).
                pl.BlockSpec((tm, IN_FEATURES), lambda i: (i, 0)),
                # Summed weight / bias stay resident across all tiles.
                pl.BlockSpec((IN_FEATURES, OUT_FEATURES), lambda i: (0, 0)),
                pl.BlockSpec((1, OUT_FEATURES), lambda i: (0, 0)),
            ],
            out_specs=pl.BlockSpec((tm, OUT_FEATURES), lambda i: (i, 0)),
        ),
        compiler_params=pltpu.CompilerParams(
            dimension_semantics=("parallel",)),
    )(x, w_sum, b_sum)


def init_linear_params(key, in_f, out_f, dtype=jnp.float32):
    """Deterministic init matching torch.nn.Linear default (U[-1/sqrt(in), 1/sqrt(in)])."""
    kw, kb = jax.random.split(key)
    bound = 1.0 / math.sqrt(in_f)
    w = jax.random.uniform(kw, (out_f, in_f), dtype, minval=-bound, maxval=bound)
    b = jax.random.uniform(kb, (out_f,), dtype, minval=-bound, maxval=bound)
    return w, b


class Model:
    def __init__(self, key):
        k1, k2, k3 = jax.random.split(key, 3)
        self.w1, self.b1 = init_linear_params(k1, IN_FEATURES, OUT_FEATURES)
        self.w2, self.b2 = init_linear_params(k2, IN_FEATURES, OUT_FEATURES)
        self.w3, self.b3 = init_linear_params(k3, IN_FEATURES, OUT_FEATURES)

        # Algebraic fusion done ONCE at init (changes f32 rounding order vs the
        # reference's three separate GEMMs, matches to ~1e-5):
        #   x@W1^T + b1 + x@W2^T + b2 + x@W3^T + b3 == x @ (W1+W2+W3)^T + (b1+b2+b3)
        # Stored pre-transposed to (in, out) at NATIVE size -- Mosaic handles the
        # (8,128) vreg padding internally, no host-side padding needed.
        self.w_sum = (self.w1 + self.w2 + self.w3).T                       # (60, 40)
        self.b_sum = (self.b1 + self.b2 + self.b3).reshape(1, OUT_FEATURES)  # (1, 40)

    def forward(self, inputs, weight1=None, weight2=None, weight3=None):
        # weight1/weight2/weight3 are accepted and unused, as in the reference.
        return fused_linear_sum(inputs, self.w_sum, self.b_sum)


if __name__ == "__main__":
    key = jax.random.PRNGKey(0)
    k_param, k_x, kw1, kw2, kw3, k_big = jax.random.split(key, 6)

    model = Model(k_param)

    # Reference case matching the PyTorch spec: batch=1, 60 features.
    x = jax.random.normal(k_x, (1, IN_FEATURES), jnp.float32)
    # Extra (unused) forward args, matching the reference signature.
    weight1 = jax.random.normal(kw1, (OUT_FEATURES, IN_FEATURES), jnp.float32)
    weight2 = jax.random.normal(kw2, (OUT_FEATURES, IN_FEATURES), jnp.float32)
    weight3 = jax.random.normal(kw3, (OUT_FEATURES, IN_FEATURES), jnp.float32)

    out = model.forward(x, weight1, weight2, weight3)
    out = jax.block_until_ready(out)

    ref = (x @ model.w1.T + model.b1
           + x @ model.w2.T + model.b2
           + x @ model.w3.T + model.b3)
    assert out.shape == (1, OUT_FEATURES)
    assert jnp.allclose(out, ref, atol=1e-5, rtol=1e-5)

    # Also exercise the gridded large-batch path (batch > TM_SINGLE, ragged tile).
    big_batch = 4100   # > 1024 -> tm=1032, grid=4 with a partial last block
    xb = jax.random.normal(k_big, (big_batch, IN_FEATURES), jnp.float32)
    out_b = jax.block_until_ready(model.forward(xb))
    ref_b = (xb @ model.w1.T + model.b1
             + xb @ model.w2.T + model.b2
             + xb @ model.w3.T + model.b3)
    assert out_b.shape == (big_batch, OUT_FEATURES)
    assert jnp.allclose(out_b, ref_b, atol=1e-4, rtol=1e-4)

    print("KERNEL_OK")
</pallas_src>

<mosaic_0001>
module attributes {stable_mosaic.version = 11 : i64} {
  func.func @_fused_linear_kernel(%arg0: i32, %arg1: memref<1x60xf32, #tpu.memory_space<vmem>>, %arg2: memref<60x40xf32, #tpu.memory_space<vmem>>, %arg3: memref<1x40xf32, #tpu.memory_space<vmem>>, %arg4: memref<1x40xf32, #tpu.memory_space<vmem>>) attributes {dimension_semantics = [#tpu.dimension_semantics<parallel>], iteration_bounds = array<i64: 1>, scalar_prefetch = 0 : i64, scratch_operands = 0 : i64, tpu.core_type = #tpu.core_type<tc>, window_params = [{transform_indices = @transform_0, window_bounds = array<i64: 1, 60>}, {pipeline_mode = #tpu.pipeline_mode<synchronous>, transform_indices = @transform_1, window_bounds = array<i64: 60, 40>}, {pipeline_mode = #tpu.pipeline_mode<synchronous>, transform_indices = @transform_2, window_bounds = array<i64: 1, 40>}, {transform_indices = @transform_3, window_bounds = array<i64: 1, 40>}]} {
    %c0 = arith.constant 0 : index
    %c0_0 = arith.constant 0 : index
    %0 = vector.load %arg1[%c0, %c0_0] : memref<1x60xf32, #tpu.memory_space<vmem>>, vector<1x60xf32>
    %c0_1 = arith.constant 0 : index
    %c0_2 = arith.constant 0 : index
    %1 = vector.load %arg2[%c0_1, %c0_2] : memref<60x40xf32, #tpu.memory_space<vmem>>, vector<60x40xf32>
    %cst = arith.constant dense<0.000000e+00> : vector<1x40xf32>
    %2 = tpu.matmul %0, %1, %cst {dimension_numbers = #tpu.dot_dimension_numbers<[1], [0], [0], [1], [0, 0, 1, 1], [], []>} : vector<1x60xf32>, vector<60x40xf32>, vector<1x40xf32> -> vector<1x40xf32>
    %c0_3 = arith.constant 0 : index
    %c0_4 = arith.constant 0 : index
    %3 = vector.load %arg3[%c0_3, %c0_4] : memref<1x40xf32, #tpu.memory_space<vmem>>, vector<1x40xf32>
    %4 = arith.addf %2, %3 : vector<1x40xf32>
    %c0_5 = arith.constant 0 : index
    %c0_6 = arith.constant 0 : index
    %5 = vector.load %arg4[%c0_5, %c0_6] : memref<1x40xf32, #tpu.memory_space<vmem>>, vector<1x40xf32>
    tpu.vector_store %arg4[%c0_5, %c0_6], %4 {strides = array<i32>} : memref<1x40xf32, #tpu.memory_space<vmem>>, vector<1x40xf32>,
    return
  }
  func.func @transform_0(%arg0: i32) -> (i32, i32) {
    %c0_i32 = arith.constant 0 : i32
    %c0_i32_0 = arith.constant 0 : i32
    return %arg0, %c0_i32 : i32, i32
  }
  func.func @transform_1(%arg0: i32) -> (i32, i32) {
    %c0_i32 = arith.constant 0 : i32
    %c0_i32_0 = arith.constant 0 : i32
    %c0_i32_1 = arith.constant 0 : i32
    return %c0_i32, %c0_i32_0 : i32, i32
  }
  func.func @transform_2(%arg0: i32) -> (i32, i32) {
    %c0_i32 = arith.constant 0 : i32
    %c0_i32_0 = arith.constant 0 : i32
    %c0_i32_1 = arith.constant 0 : i32
    return %c0_i32, %c0_i32_0 : i32, i32
  }
  func.func @transform_3(%arg0: i32) -> (i32, i32) {
    %c0_i32 = arith.constant 0 : i32
    %c0_i32_0 = arith.constant 0 : i32
    return %arg0, %c0_i32 : i32, i32
  }
}

</mosaic_0001>

<bundles_post_ra>
// kernel: tpu_custom_call.1
= control target key start
LH: loop header
LB: loop body
LE: loop exit
PB: predicated region body
PF: predicated region fallthrough
CT: control target
= control target key end

     0   :  { %v191_v3 = vmov 0.0|0.0   ;;  %vm192_vm0 = vmmov 0   ;;  %v193_v6 = vmov 0.0   ;;  %s258_s0 = inlined_call_operand.vmem [shape: f32[1,60], index: 0, kind: input, shape index: {}]   ;;  %s259_s1 = inlined_call_operand.vmem [shape: f32[60,40], index: 1, kind: input, shape index: {}]   ;;  %s260_s2 = inlined_call_operand.vmem [shape: f32[1,40], index: 2, kind: input, shape index: {}]   ;;  %s261_s3 = inlined_call_operand.hbm [shape: f32[1,40], index: 3, kind: output, shape index: {}]  }
   0x1   :  { %v16_v0 = vld [vmem:[%s259_s1] sm:$0xff]  ;;  %v17_v1 = vld [vmem:[%s259_s1 + $0x8] sm:$0xff]  ;;  %v18_v2 = vld [vmem:[%s259_s1 + $0x10] sm:$0xff]  ;;  %149 = vmatprep.subr.bf16.mxu0 %v191_v3  ;;  %146 = vmatprep.mubr.msk.f32.mxu0 %vm192_vm0, %v193_v6 }
   0x2   :  { %v150_v4 = vpack.c.bf16 %v17_v1, %v16_v0  ;;  %v19_v5 = vld [vmem:[%s259_s1 + $0x18] sm:$0xff] }
   0x3   :  { %v153_v7 = vpack.c.bf16 %v19_v5, %v18_v2 }
   0x4   :  { %151 = vmatpush3.bf16.msra.mxu0 %v150_v4 }
   0x5   :  { %8 = vsyncpa [#allocation3], 0  ;;  %152 = vmatprep.subr.bf16.mxu0 %v191_v3  ;;  %v20_v8 = vld [vmem:[%s259_s1 + $0x20] sm:$0xff]  ;;  %v21_v9 = vld [vmem:[%s259_s1 + $0x28] sm:$0xff]  ;;  %vm29_vm1 = vcmask 1043456   ;;  %vm194_vm2 = vmmov 1  }
   0x6   :  { %v156_v10 = vpack.c.bf16 %v21_v9, %v20_v8  ;;  %v22_v11 = vld [vmem:[%s259_s1 + $0x30] sm:$0xff]  ;;  %v23_v12 = vld [vmem:[%s259_s1 + $0x38] sm:$0xf]  ;;  %vm160_vm3 = vmpackc.low %vm29_vm1, %vm194_vm2  ;;  %vm25_vm4 = vcmask 490496   ;;  %s195_s5 = smov [#allocation2]   ;;  %vm103_vm5 = vcmask 319488  }
   0x7   :  { %v159_v13 = vpack.c.bf16 %v23_v12, %v22_v11  ;;  %v15_v14 = vld [vmem:[%s258_s0] sm:$0x1]  ;;  %s111_s6 = sshll.u32 %s195_s5, 4  ;;  %s112_s6 = int_to_ptr.vmem [resolvable:$true] %s111_s6 }
   0x8   :  { %154 = vmatpush3.bf16.msra.mxu0 %v153_v7  ;;  %v24_v15 = vld [vmem:[%s260_s2] sm:$0x1]  ;;  %s167_s1 = scalar_lea.vmem %s112_s6, 16  ;;  %s171_s7 = scalar_lea.vmem %s112_s6, 32 }
   0x9   :  { %155 = vmatprep.subr.bf16.mxu0 %v191_v3  ;;  %p168_p0 = scmp.ne.s32.totalorder %s112_s6, %s167_s1  ;;  %p172_p1 = scmp.lt.s32.totalorder %s112_s6, %s112_s6 }
   0xa   :  { %p173_p2 = scmp.lt.s32.totalorder %s171_s7, %s167_s1 }
   0xc   :  { %157 = vmatpush3.bf16.msra.mxu0 %v156_v10  ;;  %p174_p3 = por %p173_p2, %p172_p1 }
   0xd   :  { %158 = vmatprep.subr.bf16.mxu0 %v191_v3 }
   0xe   :  { %p175_p4 = pnand %p174_p3, %p168_p0 }
  0x10   :  { %161 = vmatpush3.bf16.msk.msra.mxu0 %vm160_vm3, %v159_v13 }
  0x13   :  { %147 = vmatmul.mubr.msk.f32.vlgmr.msra.gmra.mrb[0].mxu0 %vm25_vm4, %v15_v14 }
  0xe6   :  { %v99_v16 = vpop.f32.mrb[0].mxu0 }
  0xe7   :  { %v100_v17 = vadd.f32 %v99_v16, %v24_v15  ;;  %v148_v18 = vpop.f32.mrb[1].mxu0 }
  0xe9   :  { %104 = vst.msk [vmem:[#allocation2] sm:$0x1] %vm103_vm5, %v100_v17 }
  0xea   :  { %178 = shalt.err (!%p175_p4)
}
  0xeb   :  { %s179_s2 = scalar_lea.hbm %s261_s3, 16 }
  0xec   :  { %p180_p5 = scmp.ne.s32.totalorder %s261_s3, %s179_s2  ;;  %p183_p6 = scmp.lt.u32.totalorder %s179_s2, %s261_s3 }
  0xee   :  { %p185_p7 = pnand %p183_p6, %p180_p5 }
  0xf0   :  { %188 = shalt.err (!%p185_p7)
}
  0xf1   :  { %114 = dma.vmem_to_hbm [thread:$0]  %s112_s6, 16, %s261_s3, [#allocation3]  }
  0xf2   :  { %189 = dma.done.wait [#allocation3], 16  }
  0xf3   :  { %190 = vsyncadd [#allocation3], 4294967280 }
  0xf4   :  { %118 = vsyncpa [#allocation3], 1 }

</bundles_post_ra>
